<compile_context>
chip_gen: v7x
topology: tpu7x:2x2x1
jax: 0.10.0
libtpu: 0.0.40
codegen_flags: <defaults>
</compile_context>

<pallas_src>
import functools

import jax
import jax.numpy as jnp
from jax.experimental import pallas as pl
from jax.experimental.pallas import tpu as pltpu


def _mlp_kernel(x_ref, w_ref, b_ref, o_ref):
    # x_ref: (2, T) batch-on-lanes tile.
    # w_ref: (4, 64, 64) packed weights, layer l at w_ref[l, :out_l, :in_l]
    #        in PyTorch (out, in) layout, zero padded elsewhere.
    # b_ref: (64, 4) packed biases, layer l in column l (rows :out_l).
    x = x_ref[...]                                     # (2, T)
    b = b_ref[...]                                     # (64, 4)

    # Layer 1 (fan-in 2): VPU broadcast-FMA, keeps the MXU push slot free.
    w1 = w_ref[0]                                      # (64, 64), live [:32, :2]
    h = w1[:32, 0:1] * x[0:1, :] + w1[:32, 1:2] * x[1:2, :] + b[:32, 0:1]
    h = jnp.maximum(h, 0.0)                            # (32, T)

    # Layer 2: (64, 32) @ (32, T) on the MXU.
    h = jnp.dot(w_ref[1][:64, :32], h,
                preferred_element_type=jnp.float32) + b[:64, 1:2]
    h = jnp.maximum(h, 0.0)                            # (64, T)

    # Layer 3: (32, 64) @ (64, T).
    h = jnp.dot(w_ref[2][:32, :64], h,
                preferred_element_type=jnp.float32) + b[:32, 2:3]
    h = jnp.maximum(h, 0.0)                            # (32, T)

    # Layer 4: (2, 32) @ (32, T) -> lane-dense (2, T) output tile.
    out = jnp.dot(w_ref[3][:2, :32], h,
                  preferred_element_type=jnp.float32) + b[:2, 3:4]
    o_ref[...] = out.astype(o_ref.dtype)


def gmodel_forward(x, params, *, tile_n=1024):
    """Pallas implementation of GModel.forward.

    x:       (N, 2) float32
    params:  dict with PyTorch-layout tensors:
             w1 (32,2), b1 (32,), w2 (64,32), b2 (64,),
             w3 (32,64), b3 (32,), w4 (2,32),  b4 (2,)
    returns: (N, 2) float32
    """
    n, d_in = x.shape
    assert d_in == 2

    # Pack all weights / biases into two small zero-padded slabs.
    w_slab = jnp.zeros((4, 64, 64), jnp.float32)
    w_slab = w_slab.at[0, :32, :2].set(params["w1"])
    w_slab = w_slab.at[1, :64, :32].set(params["w2"])
    w_slab = w_slab.at[2, :32, :64].set(params["w3"])
    w_slab = w_slab.at[3, :2, :32].set(params["w4"])
    b_slab = jnp.zeros((64, 4), jnp.float32)
    b_slab = b_slab.at[:32, 0].set(params["b1"])
    b_slab = b_slab.at[:64, 1].set(params["b2"])
    b_slab = b_slab.at[:32, 2].set(params["b3"])
    b_slab = b_slab.at[:2, 3].set(params["b4"])

    # Batch on lanes: present the data as (2, N).
    xt = x.T

    if n <= tile_n:
        tile, n_pad = n, n                 # whole batch in one grid step
    else:
        tile = tile_n
        n_pad = -(-n // tile) * tile       # pad batch to a tile multiple
        if n_pad != n:
            xt = jnp.pad(xt, ((0, 0), (0, n_pad - n)))

    out_t = pl.pallas_call(
        _mlp_kernel,
        out_shape=jax.ShapeDtypeStruct((2, n_pad), x.dtype),
        grid=(n_pad // tile,),
        in_specs=[
            pl.BlockSpec((2, tile), lambda i: (0, i)),        # x tile (lane-dense)
            pl.BlockSpec((4, 64, 64), lambda i: (0, 0, 0)),   # fused weights
            pl.BlockSpec((64, 4), lambda i: (0, 0)),          # fused biases
        ],
        out_specs=pl.BlockSpec((2, tile), lambda i: (0, i)),
        compiler_params=pltpu.CompilerParams(
            dimension_semantics=("parallel",)),
    )(xt, w_slab, b_slab)

    return out_t[:, :n].T


def init_params(key):
    """Deterministic init matching nn.Linear default (U[-1/sqrt(fan_in), +]),
    stored in PyTorch-native (out, in) layout."""
    dims = [(2, 32), (32, 64), (64, 32), (32, 2)]
    params = {}
    for idx, (fan_in, fan_out) in enumerate(dims, start=1):
        key, kw, kb = jax.random.split(key, 3)
        bound = 1.0 / jnp.sqrt(float(fan_in))
        params[f"w{idx}"] = jax.random.uniform(
            kw, (fan_out, fan_in), jnp.float32, -bound, bound)
        params[f"b{idx}"] = jax.random.uniform(
            kb, (fan_out,), jnp.float32, -bound, bound)
    return params


def reference_forward(x, params):
    h = jnp.maximum(x @ params["w1"].T + params["b1"], 0.0)
    h = jnp.maximum(h @ params["w2"].T + params["b2"], 0.0)
    h = jnp.maximum(h @ params["w3"].T + params["b3"], 0.0)
    return h @ params["w4"].T + params["b4"]


if __name__ == "__main__":
    key = jax.random.PRNGKey(0)
    kp, kx = jax.random.split(key)

    params = init_params(kp)
    # data: (batch, 2) -- 2-D points, matching nn.Linear(2, ...) input.
    x = jax.random.normal(kx, (64, 2), jnp.float32)

    fwd = jax.jit(functools.partial(gmodel_forward, tile_n=1024))
    out = jax.block_until_ready(fwd(x, params))

    ref = reference_forward(x, params)
    assert out.shape == (64, 2)
    assert jnp.allclose(out, ref, atol=1e-5, rtol=1e-5), "mismatch vs reference"

    print("KERNEL_OK")
</pallas_src>

<mosaic_0001>
module attributes {stable_mosaic.version = 11 : i64} {
  func.func @_mlp_kernel(%arg0: i32, %arg1: memref<2x64xf32, #tpu.memory_space<vmem>>, %arg2: memref<4x64x64xf32, #tpu.memory_space<vmem>>, %arg3: memref<64x4xf32, #tpu.memory_space<vmem>>, %arg4: memref<2x64xf32, #tpu.memory_space<vmem>>) attributes {dimension_semantics = [#tpu.dimension_semantics<parallel>], iteration_bounds = array<i64: 1>, scalar_prefetch = 0 : i64, scratch_operands = 0 : i64, tpu.core_type = #tpu.core_type<tc>, window_params = [{transform_indices = @transform_0, window_bounds = array<i64: 2, 64>}, {pipeline_mode = #tpu.pipeline_mode<synchronous>, transform_indices = @transform_1, window_bounds = array<i64: 4, 64, 64>}, {pipeline_mode = #tpu.pipeline_mode<synchronous>, transform_indices = @transform_2, window_bounds = array<i64: 64, 4>}, {transform_indices = @transform_3, window_bounds = array<i64: 2, 64>}]} {
    %c0 = arith.constant 0 : index
    %c0_0 = arith.constant 0 : index
    %0 = vector.load %arg1[%c0, %c0_0] : memref<2x64xf32, #tpu.memory_space<vmem>>, vector<2x64xf32>
    %c0_1 = arith.constant 0 : index
    %c0_2 = arith.constant 0 : index
    %1 = vector.load %arg3[%c0_1, %c0_2] : memref<64x4xf32, #tpu.memory_space<vmem>>, vector<64x4xf32>
    %c0_3 = arith.constant 0 : index
    %c0_4 = arith.constant 0 : index
    %c0_5 = arith.constant 0 : index
    %2 = vector.load %arg2[%c0_3, %c0_4, %c0_5] : memref<4x64x64xf32, #tpu.memory_space<vmem>>, vector<1x64x64xf32>
    %3 = vector.shape_cast %2 : vector<1x64x64xf32> to vector<64x64xf32>
    %4 = vector.extract_strided_slice %3 {offsets = [0, 0], sizes = [32, 1], strides = [1, 1]} : vector<64x64xf32> to vector<32x1xf32>
    %5 = vector.extract_strided_slice %0 {offsets = [0, 0], sizes = [1, 64], strides = [1, 1]} : vector<2x64xf32> to vector<1x64xf32>
    %6 = vector.broadcast %4 : vector<32x1xf32> to vector<32x64xf32>
    %7 = vector.broadcast %5 : vector<1x64xf32> to vector<32x64xf32>
    %8 = arith.mulf %6, %7 : vector<32x64xf32>
    %9 = vector.extract_strided_slice %3 {offsets = [0, 1], sizes = [32, 1], strides = [1, 1]} : vector<64x64xf32> to vector<32x1xf32>
    %10 = vector.extract_strided_slice %0 {offsets = [1, 0], sizes = [1, 64], strides = [1, 1]} : vector<2x64xf32> to vector<1x64xf32>
    %11 = vector.broadcast %9 : vector<32x1xf32> to vector<32x64xf32>
    %12 = vector.broadcast %10 : vector<1x64xf32> to vector<32x64xf32>
    %13 = arith.mulf %11, %12 : vector<32x64xf32>
    %14 = arith.addf %8, %13 : vector<32x64xf32>
    %15 = vector.extract_strided_slice %1 {offsets = [0, 0], sizes = [32, 1], strides = [1, 1]} : vector<64x4xf32> to vector<32x1xf32>
    %16 = vector.broadcast %15 : vector<32x1xf32> to vector<32x64xf32>
    %17 = arith.addf %14, %16 : vector<32x64xf32>
    %cst = arith.constant 0.000000e+00 : f32
    %18 = vector.broadcast %cst : f32 to vector<32x64xf32>
    %19 = arith.maximumf %17, %18 : vector<32x64xf32>
    %c1 = arith.constant 1 : index
    %c0_6 = arith.constant 0 : index
    %c0_7 = arith.constant 0 : index
    %20 = vector.load %arg2[%c1, %c0_6, %c0_7] : memref<4x64x64xf32, #tpu.memory_space<vmem>>, vector<1x64x64xf32>
    %21 = vector.shape_cast %20 : vector<1x64x64xf32> to vector<64x64xf32>
    %22 = vector.extract_strided_slice %21 {offsets = [0, 0], sizes = [64, 32], strides = [1, 1]} : vector<64x64xf32> to vector<64x32xf32>
    %cst_8 = arith.constant dense<0.000000e+00> : vector<64x64xf32>
    %23 = tpu.matmul %22, %19, %cst_8 {dimension_numbers = #tpu.dot_dimension_numbers<[1], [0], [0], [1], [0, 0, 1, 1], [], []>} : vector<64x32xf32>, vector<32x64xf32>, vector<64x64xf32> -> vector<64x64xf32>
    %24 = vector.extract_strided_slice %1 {offsets = [0, 1], sizes = [64, 1], strides = [1, 1]} : vector<64x4xf32> to vector<64x1xf32>
    %25 = vector.broadcast %24 : vector<64x1xf32> to vector<64x64xf32>
    %26 = arith.addf %23, %25 : vector<64x64xf32>
    %cst_9 = arith.constant 0.000000e+00 : f32
    %27 = vector.broadcast %cst_9 : f32 to vector<64x64xf32>
    %28 = arith.maximumf %26, %27 : vector<64x64xf32>
    %c2 = arith.constant 2 : index
    %c0_10 = arith.constant 0 : index
    %c0_11 = arith.constant 0 : index
    %29 = vector.load %arg2[%c2, %c0_10, %c0_11] : memref<4x64x64xf32, #tpu.memory_space<vmem>>, vector<1x64x64xf32>
    %30 = vector.shape_cast %29 : vector<1x64x64xf32> to vector<64x64xf32>
    %31 = vector.extract_strided_slice %30 {offsets = [0, 0], sizes = [32, 64], strides = [1, 1]} : vector<64x64xf32> to vector<32x64xf32>
    %cst_12 = arith.constant dense<0.000000e+00> : vector<32x64xf32>
    %32 = tpu.matmul %31, %28, %cst_12 {dimension_numbers = #tpu.dot_dimension_numbers<[1], [0], [0], [1], [0, 0, 1, 1], [], []>} : vector<32x64xf32>, vector<64x64xf32>, vector<32x64xf32> -> vector<32x64xf32>
    %33 = vector.extract_strided_slice %1 {offsets = [0, 2], sizes = [32, 1], strides = [1, 1]} : vector<64x4xf32> to vector<32x1xf32>
    %34 = vector.broadcast %33 : vector<32x1xf32> to vector<32x64xf32>
    %35 = arith.addf %32, %34 : vector<32x64xf32>
    %cst_13 = arith.constant 0.000000e+00 : f32
    %36 = vector.broadcast %cst_13 : f32 to vector<32x64xf32>
    %37 = arith.maximumf %35, %36 : vector<32x64xf32>
    %c3 = arith.constant 3 : index
    %c0_14 = arith.constant 0 : index
    %c0_15 = arith.constant 0 : index
    %38 = vector.load %arg2[%c3, %c0_14, %c0_15] : memref<4x64x64xf32, #tpu.memory_space<vmem>>, vector<1x64x64xf32>
    %39 = vector.shape_cast %38 : vector<1x64x64xf32> to vector<64x64xf32>
    %40 = vector.extract_strided_slice %39 {offsets = [0, 0], sizes = [2, 32], strides = [1, 1]} : vector<64x64xf32> to vector<2x32xf32>
    %cst_16 = arith.constant dense<0.000000e+00> : vector<2x64xf32>
    %41 = tpu.matmul %40, %37, %cst_16 {dimension_numbers = #tpu.dot_dimension_numbers<[1], [0], [0], [1], [0, 0, 1, 1], [], []>} : vector<2x32xf32>, vector<32x64xf32>, vector<2x64xf32> -> vector<2x64xf32>
    %42 = vector.extract_strided_slice %1 {offsets = [0, 3], sizes = [2, 1], strides = [1, 1]} : vector<64x4xf32> to vector<2x1xf32>
    %43 = vector.broadcast %42 : vector<2x1xf32> to vector<2x64xf32>
    %44 = arith.addf %41, %43 : vector<2x64xf32>
    %c0_17 = arith.constant 0 : index
    %c0_18 = arith.constant 0 : index
    %45 = vector.load %arg4[%c0_17, %c0_18] : memref<2x64xf32, #tpu.memory_space<vmem>>, vector<2x64xf32>
    tpu.vector_store %arg4[%c0_17, %c0_18], %44 {strides = array<i32>} : memref<2x64xf32, #tpu.memory_space<vmem>>, vector<2x64xf32>,
    return
  }
  func.func @transform_0(%arg0: i32) -> (i32, i32) {
    %c0_i32 = arith.constant 0 : i32
    %c0_i32_0 = arith.constant 0 : i32
    return %c0_i32, %arg0 : i32, i32
  }
  func.func @transform_1(%arg0: i32) -> (i32, i32, i32) {
    %c0_i32 = arith.constant 0 : i32
    %c0_i32_0 = arith.constant 0 : i32
    %c0_i32_1 = arith.constant 0 : i32
    %c0_i32_2 = arith.constant 0 : i32
    return %c0_i32, %c0_i32_0, %c0_i32_1 : i32, i32, i32
  }
  func.func @transform_2(%arg0: i32) -> (i32, i32) {
    %c0_i32 = arith.constant 0 : i32
    %c0_i32_0 = arith.constant 0 : i32
    %c0_i32_1 = arith.constant 0 : i32
    return %c0_i32, %c0_i32_0 : i32, i32
  }
  func.func @transform_3(%arg0: i32) -> (i32, i32) {
    %c0_i32 = arith.constant 0 : i32
    %c0_i32_0 = arith.constant 0 : i32
    return %c0_i32, %arg0 : i32, i32
  }
}

</mosaic_0001>

<bundles_post_ra>
// kernel: gmodel_forward.1
= control target key start
LH: loop header
LB: loop body
LE: loop exit
PB: predicated region body
PF: predicated region fallthrough
CT: control target
= control target key end

     0   :  { %v694_v2 = vmov 1   ;;  %s846_s0 = inlined_call_operand.vmem [shape: f32[2,64], index: 0, kind: input, shape index: {}]   ;;  %s847_s1 = inlined_call_operand.vmem [shape: f32[4,64,64], index: 1, kind: input, shape index: {}]   ;;  %s848_s2 = inlined_call_operand.vmem [shape: f32[64,4], index: 2, kind: input, shape index: {}]   ;;  %s849_s3 = inlined_call_operand.hbm [shape: f32[2,64], index: 3, kind: output, shape index: {}]  }
   0x1   :  { %v26_v0 = vld [vmem:[%s847_s1 + $0x10] sm:$0xff]  ;;  %v24_v1 = vld [vmem:[%s847_s1] sm:$0xff]  ;;  %661 = vset.pattern.permute.xlu0 %v694_v2  ;;  %659 = vset.pattern.permute.xlu1 %v694_v2  ;;  %v25_v3 = vld [vmem:[%s847_s1 + $0x8] sm:$0xff] }
   0x2   :  { %65 = vperm.xlu0 %661, %v26_v0   ;;  %57 = vperm.xlu1 %659, %v24_v1  }
   0x3   :  { %8 = vsyncpa [#allocation3], 0  ;;  %v695_v4 = vmov 0   ;;  %v27_v5 = vld [vmem:[%s847_s1 + $0x18] sm:$0xff]  ;;  %v737_v6 = vld [vmem:[%s848_s2 + $0x8] sm:$0xff]  ;;  %vm157_vm0 = vcmask 261120   ;;  %v48_v15 = vlaneseq }
   0x4   :  { %v742_v7 = vld [vmem:[%s848_s2] sm:$0xff]  ;;  %v749_v8 = vld [vmem:[%s848_s2 + $0x10] sm:$0xff]  ;;  %v756_v9 = vld [vmem:[%s848_s2 + $0x18] sm:$0xff]  ;;  %vm316_vm1 = vcmask 523264   ;;  %vm698_vm2 = vmmov 0   ;;  %s701_s8 = smov [#allocation2]  }
   0x5   :  { %v513_v10 = vld [vmem:[%s847_s1 + $0x40] sm:$0xff]  ;;  %v21_v11 = vld [vmem:[%s848_s2 + $0x28] sm:$0xff]  ;;  %v23_v13 = vld [vmem:[%s848_s2 + $0x38] sm:$0xff]  ;;  %v49_v18 = vshrl.u32 %v48_v15, 7  ;;  %s505_s9 = sshll.u32 %s701_s8, 4  ;;  %vm497_vm3 = vcmask 517120   ;;  %s506_s9 = int_to_ptr.vmem [resolvable:$true] %s505_s9 }
   0x6   :  { %662 = vset.pattern.permute.xlu0 %v695_v4  ;;  %61 = vperm.xlu1 %659, %v25_v3   ;;  %v20_v12 = vld [vmem:[%s848_s2 + $0x20] sm:$0xff]  ;;  %v22_v14 = vld [vmem:[%s848_s2 + $0x30] sm:$0xff]  ;;  %v514_v56 = vld [vmem:[%s847_s1 + $0x48] sm:$0xff]  ;;  %s670_s10 = scalar_lea.vmem %s506_s9, 32  ;;  %p675_p1 = scmp.lt.s32.totalorder %s506_s9, %s506_s9 }
   0x7   :  { %30 = vperm.xlu0 %662, %v24_v1   ;;  %576 = vmatprep.mubr.msk.f32.mxu0 %vm157_vm0, %v513_v10  ;;  %v50_v21 = vsub.s32 0, %v49_v18  ;;  %v74_v22 = vsub.s32 1, %v49_v18  ;;  %v15_v23 = vld [vmem:[%s846_s0] sm:$0x3]  ;;  %v515_v57 = vld [vmem:[%s847_s1 + $0x50] sm:$0xff]  ;;  %v516_v58 = vld [vmem:[%s847_s1 + $0x58] sm:$0xff]  ;;  %p671_p0 = scmp.ne.s32.totalorder %s506_s9, %s670_s10  ;;  %p676_p2 = scmp.lt.s32.totalorder %s670_s10, %s670_s10 }
   0x8   :  { %v517_v59 = vld [vmem:[%s847_s1 + $0x60] sm:$0xff]  ;;  %v518_v60 = vld [vmem:[%s847_s1 + $0x68] sm:$0xff]  ;;  %v519_v61 = vld [vmem:[%s847_s1 + $0x70] sm:$0xff] }
   0x9   :  { %v51_v26 = vrot.slane %v15_v23, %v50_v21  ;;  %v75_v27 = vrot.slane %v15_v23, %v74_v22  ;;  %v520_v62 = vld [vmem:[%s847_s1 + $0x78] sm:$0xff]  ;;  %v529_v63 = vld [vmem:[%s847_s1 + $0x80] sm:$0xff]  ;;  %p677_p3 = por %p676_p2, %p675_p1 }
   0xa   :  { %660 = vset.pattern.permute.xlu1 %v695_v4  ;;  %604 = vmatprep.mubr.msk.f32.mxu1 %vm316_vm1, %v529_v63 }
   0xb   :  { %35 = vperm.xlu0 %662, %v25_v3   ;;  %45 = vperm.xlu1 %660, %v27_v5   ;;  %p678_p4 = pnand %p677_p3, %p671_p0 }
   0xf   :  { %40 = vperm.xlu0 %662, %v26_v0   ;;  %663 = vset.pattern.permute.xlu1 %v694_v2  ;;  %v696_v0 = vmov 2  }
  0x10   :  { %69 = vperm.xlu1 %663, %v27_v5  }
  0x13   :  { %91 = vperm.xlu0 %662, %v737_v6  }
  0x14   :  { %664 = vset.pattern.permute.xlu1 %v695_v4 }
  0x15   :  { %86 = vperm.xlu1 %664, %v742_v7  }
  0x17   :  { %665 = vset.pattern.permute.xlu0 %v694_v2 }
  0x18   :  { %122 = vperm.xlu0 %665, %v742_v7  }
  0x19   :  { %96 = vperm.xlu1 %664, %v749_v8  }
  0x1c   :  { %134 = vperm.xlu0 %665, %v756_v9  }
  0x1d   :  { %101 = vperm.xlu1 %664, %v756_v9  }
  0x20   :  { %144 = vperm.xlu0 %665, %v21_v11  }
  0x21   :  { %666 = vset.pattern.permute.xlu1 %v694_v2 }
  0x22   :  { %126 = vperm.xlu1 %666, %v737_v6  }
  0x24   :  { %154 = vperm.xlu0 %665, %v23_v13  }
  0x26   :  { %130 = vperm.xlu1 %666, %v749_v8  }
  0x28   :  { %668 = vset.pattern.permute.xlu0 %v696_v0 }
  0x29   :  { %305 = vperm.xlu0 %668, %v737_v6  }
  0x2a   :  { %139 = vperm.xlu1 %666, %v20_v12  }
  0x2e   :  { %149 = vperm.xlu1 %666, %v22_v14  }
  0x32   :  { %667 = vset.pattern.permute.xlu1 %v696_v0 }
  0x33   :  { %301 = vperm.xlu1 %667, %v742_v7  }
  0x37   :  { %309 = vperm.xlu1 %667, %v749_v8  }
  0x3b   :  { %313 = vperm.xlu1 %667, %v756_v9  }
  0x81   :  { %v58_v16 = vpop.permute.xlu1 %57  ;;  %v66_v17 = vpop.permute.xlu0 %65 }
  0x82   :  { %v76_v33 = vmul.f32 %v75_v27, %v58_v16  ;;  %v78_v41 = vmul.f32 %v75_v27, %v66_v17 }
  0x85   :  { %v62_v19 = vpop.permute.xlu1 %61 }
  0x86   :  { %v31_v20 = vpop.permute.xlu0 %30  ;;  %v77_v30 = vmul.f32 %v75_v27, %v62_v19 }
  0x87   :  { %v52_v31 = vmul.f32 %v51_v26, %v31_v20 }
  0x89   :  { %v80_v37 = vadd.f32 %v76_v33, %v52_v31 }
  0x8a   :  { %v36_v24 = vpop.permute.xlu0 %35  ;;  %v46_v25 = vpop.permute.xlu1 %45 }
  0x8b   :  { %v53_v28 = vmul.f32 %v51_v26, %v36_v24  ;;  %v55_v46 = vmul.f32 %v51_v26, %v46_v25 }
  0x8d   :  { %v81_v34 = vadd.f32 %v77_v30, %v53_v28 }
  0x8e   :  { %v41_v29 = vpop.permute.xlu0 %40 }
  0x8f   :  { %v70_v32 = vpop.permute.xlu1 %69  ;;  %v54_v39 = vmul.f32 %v51_v26, %v41_v29 }
  0x90   :  { %v79_v42 = vmul.f32 %v75_v27, %v70_v32 }
  0x91   :  { %v82_v47 = vadd.f32 %v78_v41, %v54_v39  ;;  %v531_v39 = vld [vmem:[%s847_s1 + $0x90] sm:$0xff]  ;;  %v697_v41 = vmov 0.0|0.0  }
  0x92   :  { %v92_v35 = vpop.permute.xlu0 %91  ;;  %v83_v50 = vadd.f32 %v79_v42, %v55_v46  ;;  %v699_v42 = vmov 0.0  }
  0x93   :  { %v105_v36 = vadd.f32 %v92_v35, %v81_v34 }
  0x94   :  { %v87_v38 = vpop.permute.xlu1 %86 }
  0x95   :  { %v104_v40 = vadd.f32 %v87_v38, %v80_v37  ;;  %v109_v43 = vmax.f32 %v105_v36, 0.0  ;;  %v530_v38 = vld [vmem:[%s847_s1 + $0x88] sm:$0xff] }
  0x97   :  { %v108_v44 = vmax.f32 %v104_v40, 0.0  ;;  %v123_v1 = vpop.permute.xlu0 %122  ;;  %v532_v40 = vld [vmem:[%s847_s1 + $0x98] sm:$0xff] }
  0x98   :  { %v97_v45 = vpop.permute.xlu1 %96 }
  0x99   :  { %v621_v48 = vpack.c.bf16 %v109_v43, %v108_v44  ;;  %v106_v49 = vadd.f32 %v97_v45, %v82_v47  ;;  %v700_v43 = vmov 3  }
  0x9a   :  { %669 = vset.pattern.permute.xlu0 %v700_v43 }
  0x9b   :  { %622 = vmatprep.subr.bf16.mxu0 %v621_v48  ;;  %v110_v53 = vmax.f32 %v106_v49, 0.0  ;;  %v135_v3 = vpop.permute.xlu0 %134  ;;  %421 = vperm.xlu0 %669, %v742_v7  }
  0x9c   :  { %v102_v51 = vpop.permute.xlu1 %101  ;;  %624 = vmatpush3.bf16.msra.mxu0 %v621_v48 }
  0x9d   :  { %v107_v52 = vadd.f32 %v102_v51, %v83_v50 }
  0x9f   :  { %v111_v54 = vmax.f32 %v107_v52, 0.0  ;;  %v145_v18 = vpop.permute.xlu0 %144 }
  0xa1   :  { %v625_v55 = vpack.c.bf16 %v111_v54, %v110_v53  ;;  %v127_v2 = vpop.permute.xlu1 %126 }
  0xa3   :  { %626 = vmatprep.subr.bf16.mxu0 %v625_v55  ;;  %v155_v27 = vpop.permute.xlu0 %154 }
  0xa4   :  { %628 = vmatpush3.bf16.msra.mxu0 %v625_v55 }
  0xa5   :  { %v131_v5 = vpop.permute.xlu1 %130  ;;  %645 = vmatprep.subr.bf16.mxu0 %v697_v41 }
  0xa7   :  { %577 = vmatmul.mubr.msk.f32.vlgmr.msra.gmra.mrb[0].mxu0 %vm157_vm0, %v514_v56 }
  0xa8   :  { %579 = vmatprep.mubr.msk.f32.mxu0 %vm157_vm0, %v515_v57  ;;  %v306_v46 = vpop.permute.xlu0 %305 }
  0xa9   :  { %v140_v20 = vpop.permute.xlu1 %139 }
  0xab   :  { %580 = vmatmul.mubr.msk.f32.gmra.mrb[2].mxu0 %vm157_vm0, %v516_v58 }
  0xac   :  { %582 = vmatprep.mubr.msk.f32.mxu0 %vm157_vm0, %v517_v59 }
  0xad   :  { %v150_v30 = vpop.permute.xlu1 %149 }
  0xaf   :  { %583 = vmatmul.mubr.msk.f32.gmra.mrb[4].mxu0 %vm157_vm0, %v518_v60 }
  0xb0   :  { %585 = vmatprep.mubr.msk.f32.mxu0 %vm157_vm0, %v519_v61  ;;  %v537_v61 = vld [vmem:[%s847_s1 + $0xc0] sm:$0xff] }
  0xb2   :  { %v302_v44 = vpop.permute.xlu1 %301 }
  0xb3   :  { %586 = vmatmul.mubr.msk.f32.gmra.mrb[6].mxu0 %vm157_vm0, %v520_v62 }
  0xb4   :  { %618 = vmatprep.mubr.msk.f32.mxu0 %vm698_vm2, %v699_v42 }
  0xb6   :  { %v310_v45 = vpop.permute.xlu1 %309 }
  0xba   :  { %v314_v52 = vpop.permute.xlu1 %313 }
 0x11a   :  { %v422_v62 = vpop.permute.xlu0 %421 }
 0x17a   :  { %v578_v4 = vpop.f32.mrb[0].mxu0 }
 0x17b   :  { %v254_v10 = vadd.f32 %v578_v4, %v127_v2  ;;  %v248_v11 = vpop.f32.mrb[1].mxu0 }
 0x17c   :  { %v249_v12 = vadd.f32 %v248_v11, %v123_v1 }
 0x17d   :  { %v288_v13 = vmax.f32 %v254_v10, 0.0 }
 0x17e   :  { %v287_v14 = vmax.f32 %v249_v12, 0.0  ;;  %v581_v15 = vpop.f32.mrb[2].mxu0 }
 0x17f   :  { %v264_v16 = vadd.f32 %v581_v15, %v135_v3  ;;  %v258_v17 = vpop.f32.mrb[3].mxu0 }
 0x180   :  { %v259_v19 = vadd.f32 %v258_v17, %v131_v5  ;;  %v629_v6 = vpack.c.bf16 %v288_v13, %v287_v14 }
 0x181   :  { %v290_v8 = vmax.f32 %v264_v16, 0.0 }
 0x182   :  { %v289_v21 = vmax.f32 %v259_v19, 0.0  ;;  %v584_v9 = vpop.f32.mrb[4].mxu0  ;;  %630 = vmatprep.subr.bf16.mxu1 %v629_v6 }
 0x183   :  { %v274_v22 = vadd.f32 %v584_v9, %v145_v18  ;;  %v268_v23 = vpop.f32.mrb[5].mxu0  ;;  %632 = vmatpush3.bf16.msra.mxu1 %v629_v6 }
 0x184   :  { %v633_v24 = vpack.c.bf16 %v290_v8, %v289_v21  ;;  %v269_v25 = vadd.f32 %v268_v23, %v140_v20 }
 0x185   :  { %v292_v26 = vmax.f32 %v274_v22, 0.0 }
 0x186   :  { %v291_v28 = vmax.f32 %v269_v25, 0.0  ;;  %v587_v29 = vpop.f32.mrb[6].mxu0  ;;  %634 = vmatprep.subr.bf16.mxu1 %v633_v24 }
 0x187   :  { %v284_v31 = vadd.f32 %v587_v29, %v155_v27  ;;  %v278_v32 = vpop.f32.mrb[7].mxu0  ;;  %636 = vmatpush3.bf16.msra.mxu1 %v633_v24 }
 0x188   :  { %v637_v33 = vpack.c.bf16 %v292_v26, %v291_v28  ;;  %v279_v34 = vadd.f32 %v278_v32, %v150_v30 }
 0x189   :  { %v294_v35 = vmax.f32 %v284_v31, 0.0 }
 0x18a   :  { %v293_v36 = vmax.f32 %v279_v34, 0.0  ;;  %638 = vmatprep.subr.bf16.mxu1 %v637_v33 }
 0x18b   :  { %640 = vmatpush3.bf16.msra.mxu1 %v637_v33 }
 0x18c   :  { %v641_v37 = vpack.c.bf16 %v294_v35, %v293_v36 }
 0x18e   :  { %642 = vmatprep.subr.bf16.mxu1 %v641_v37 }
 0x18f   :  { %644 = vmatpush3.bf16.msra.mxu1 %v641_v37 }
 0x192   :  { %605 = vmatmul.mubr.msk.f32.vlgmr.msra.gmra.mrb[0].mxu1 %vm316_vm1, %v530_v38 }
 0x193   :  { %607 = vmatprep.mubr.msk.f32.mxu1 %vm316_vm1, %v531_v39 }
 0x196   :  { %608 = vmatmul.mubr.msk.f32.gmra.mrb[2].mxu1 %vm316_vm1, %v532_v40 }
 0x265   :  { %v606_v47 = vpop.f32.mrb[0].mxu1 }
 0x266   :  { %v401_v48 = vadd.f32 %v606_v47, %v306_v46  ;;  %v395_v49 = vpop.f32.mrb[1].mxu1 }
 0x267   :  { %v396_v50 = vadd.f32 %v395_v49, %v302_v44 }
 0x268   :  { %v415_v51 = vmax.f32 %v401_v48, 0.0 }
 0x269   :  { %v414_v53 = vmax.f32 %v396_v50, 0.0  ;;  %v609_v54 = vpop.f32.mrb[2].mxu1 }
 0x26a   :  { %v411_v55 = vadd.f32 %v609_v54, %v314_v52  ;;  %v405_v56 = vpop.f32.mrb[3].mxu1 }
 0x26b   :  { %v646_v57 = vpack.c.bf16 %v415_v51, %v414_v53  ;;  %v406_v58 = vadd.f32 %v405_v56, %v310_v45 }
 0x26c   :  { %v417_v59 = vmax.f32 %v411_v55, 0.0 }
 0x26d   :  { %v416_v60 = vmax.f32 %v406_v58, 0.0  ;;  %647 = vmatpush3.bf16.msra.mxu0 %v646_v57 }
 0x26e   :  { %648 = vmatprep.subr.bf16.mxu0 %v697_v41 }
 0x26f   :  { %v649_v7 = vpack.c.bf16 %v417_v59, %v416_v60 }
 0x271   :  { %650 = vmatpush3.bf16.msra.mxu0 %v649_v7 }
 0x274   :  { %619 = vmatmul.mubr.msk.f32.vlgmr.msra.gmra.mrb[8].mxu0 %vm157_vm0, %v537_v61 }
 0x347   :  { %v493_v63 = vpop.f32.mrb[8].mxu0 }
 0x348   :  { %v494_v0 = vadd.f32 %v493_v63, %v422_v62  ;;  %v620_v1 = vpop.f32.mrb[9].mxu0 }
 0x34a   :  { %498 = vst.msk [vmem:[#allocation2] sm:$0x3] %vm497_vm3, %v494_v0 }
 0x34b   :  { %681 = shalt.err (!%p678_p4)
}
 0x34c   :  { %s682_s12 = scalar_lea.hbm %s849_s3, 32 }
 0x34d   :  { %p683_p5 = scmp.ne.s32.totalorder %s849_s3, %s682_s12  ;;  %p686_p6 = scmp.lt.u32.totalorder %s682_s12, %s849_s3 }
 0x34f   :  { %p688_p7 = pnand %p686_p6, %p683_p5 }
 0x351   :  { %691 = shalt.err (!%p688_p7)
}
 0x352   :  { %508 = dma.vmem_to_hbm [thread:$0]  %s506_s9, 32, %s849_s3, [#allocation3]  }
 0x353   :  { %692 = dma.done.wait [#allocation3], 32  }
 0x354   :  { %693 = vsyncadd [#allocation3], 4294967264 }
 0x355   :  { %512 = vsyncpa [#allocation3], 1 }

</bundles_post_ra>
